<compile_context>
chip_gen: v5e
topology: v5e:2x2
jax: 0.10.0
libtpu: 0.0.40
codegen_flags: <defaults>
</compile_context>

<pallas_src>
import math
import jax
import jax.numpy as jnp
from jax.experimental import pallas as pl
from jax.experimental.pallas import tpu as pltpu


def _timestep_embedder_kernel(t_ref, freqs_ref, w1_ref, b1_ref, w2_ref, b2_ref,
                              out_ref, emb_ref):
    half = freqs_ref.shape[-1]

    # args = t[:, None] * freqs[None, :]  -> (tile_n, half) via broadcast
    args = t_ref[...] * freqs_ref[...]

    # Build emb = [cos | sin] directly in a VMEM scratch (lane-aligned halves),
    # so the first linear is one K = 2*half contraction on the MXU.
    emb_ref[:, :half] = jnp.cos(args)
    emb_ref[:, half:] = jnp.sin(args)

    h = (jnp.dot(emb_ref[...], w1_ref[...], preferred_element_type=jnp.float32)
         + b1_ref[...])

    # SiLU (single EUP transcendental via logistic lowering).
    h = h * jax.nn.sigmoid(h)

    out = jnp.dot(h, w2_ref[...], preferred_element_type=jnp.float32) + b2_ref[...]
    out_ref[...] = out.astype(out_ref.dtype)


def timestep_embedder_forward(t, freqs, w1, b1, w2, b2, *, tile_n_max=512):
    """t: (B, T) f32. Returns (B, T, hidden) f32."""
    B, T = t.shape
    N = B * T
    half = freqs.shape[0]
    fdim = 2 * half
    hidden = w1.shape[1]

    # Choose a row tile (multiple of 8) and pad N up to a multiple of it.
    if N <= tile_n_max:
        tile_n = max(8, ((N + 7) // 8) * 8)
    else:
        tile_n = tile_n_max
    n_pad = ((N + tile_n - 1) // tile_n) * tile_n
    grid_n = n_pad // tile_n

    t_flat = t.reshape(N, 1).astype(jnp.float32)
    if n_pad != N:
        t_flat = jnp.pad(t_flat, ((0, n_pad - N), (0, 0)))
    freqs_2d = freqs.reshape(1, half).astype(jnp.float32)
    b1_2d = b1.reshape(1, hidden)
    b2_2d = b2.reshape(1, hidden)

    # Advisory cost: the kernel is transcendental-bound (cos + sin + sigmoid).
    cost = pl.CostEstimate(
        flops=2 * N * (fdim * hidden + hidden * hidden),
        transcendentals=N * (fdim + hidden),
        bytes_accessed=4 * (N + half + fdim * hidden + hidden
                            + hidden * hidden + hidden + N * hidden),
    )

    out = pl.pallas_call(
        _timestep_embedder_kernel,
        out_shape=jax.ShapeDtypeStruct((n_pad, hidden), jnp.float32),
        grid_spec=pltpu.PrefetchScalarGridSpec(
            num_scalar_prefetch=0,
            grid=(grid_n,),
            in_specs=[
                pl.BlockSpec((tile_n, 1), lambda i: (i, 0)),     # t rows
                pl.BlockSpec((1, half), lambda i: (0, 0)),       # freqs (resident)
                pl.BlockSpec((fdim, hidden), lambda i: (0, 0)),  # W1 (resident)
                pl.BlockSpec((1, hidden), lambda i: (0, 0)),     # b1 (resident)
                pl.BlockSpec((hidden, hidden), lambda i: (0, 0)),  # W2 (resident)
                pl.BlockSpec((1, hidden), lambda i: (0, 0)),     # b2 (resident)
            ],
            out_specs=pl.BlockSpec((tile_n, hidden), lambda i: (i, 0)),
            scratch_shapes=[pltpu.VMEM((tile_n, fdim), jnp.float32)],
        ),
        compiler_params=pltpu.CompilerParams(
            dimension_semantics=("parallel",),
        ),
        cost_estimate=cost,
    )(t_flat, freqs_2d, w1, b1_2d, w2, b2_2d)

    return out[:N].reshape(B, T, hidden)


def make_freqs(frequency_embedding_size, max_period=10000):
    half = frequency_embedding_size // 2
    return jnp.exp(
        -math.log(max_period) * jnp.arange(half, dtype=jnp.float32) / half
    )


def reference_forward(t, freqs, w1, b1, w2, b2):
    """Pure-JAX reference mirroring the PyTorch module."""
    args = t[:, :, None].astype(jnp.float32) * freqs[None, None, :]
    emb = jnp.concatenate([jnp.cos(args), jnp.sin(args)], axis=-1)
    h = emb @ w1 + b1
    h = h * jax.nn.sigmoid(h)
    return h @ w2 + b2


if __name__ == "__main__":
    # Small shapes consistent with the module.
    B, T = 2, 8
    frequency_embedding_size = 256
    hidden_size = 128

    key = jax.random.PRNGKey(0)
    k_t, k_w1, k_b1, k_w2, k_b2 = jax.random.split(key, 5)

    # Deterministic synthetic parameters (shapes from nn.Linear in __init__).
    t = jax.random.uniform(k_t, (B, T), dtype=jnp.float32) * 1000.0
    w1 = jax.random.normal(k_w1, (frequency_embedding_size, hidden_size),
                           dtype=jnp.float32) * 0.02
    b1 = jax.random.normal(k_b1, (hidden_size,), dtype=jnp.float32) * 0.02
    w2 = jax.random.normal(k_w2, (hidden_size, hidden_size),
                           dtype=jnp.float32) * 0.02
    b2 = jax.random.normal(k_b2, (hidden_size,), dtype=jnp.float32) * 0.02

    freqs = make_freqs(frequency_embedding_size)

    out = timestep_embedder_forward(t, freqs, w1, b1, w2, b2)
    out = jax.block_until_ready(out)

    ref = reference_forward(t, freqs, w1, b1, w2, b2)
    assert out.shape == (B, T, hidden_size)
    assert jnp.allclose(out, ref, atol=1e-4, rtol=1e-4), (
        f"max abs err {jnp.max(jnp.abs(out - ref))}")

    print("KERNEL_OK")
</pallas_src>

<mosaic_0001>
module attributes {stable_mosaic.version = 11 : i64} {
  func.func @_timestep_embedder_kernel(%arg0: i32, %arg1: memref<16x1xf32, #tpu.memory_space<vmem>>, %arg2: memref<1x128xf32, #tpu.memory_space<vmem>>, %arg3: memref<256x128xf32, #tpu.memory_space<vmem>>, %arg4: memref<1x128xf32, #tpu.memory_space<vmem>>, %arg5: memref<128x128xf32, #tpu.memory_space<vmem>>, %arg6: memref<1x128xf32, #tpu.memory_space<vmem>>, %arg7: memref<16x128xf32, #tpu.memory_space<vmem>>, %arg8: memref<16x256xf32, #tpu.memory_space<vmem>>) attributes {dimension_semantics = [#tpu.dimension_semantics<parallel>], iteration_bounds = array<i64: 1>, scalar_prefetch = 0 : i64, scratch_operands = 1 : i64, tpu.core_type = #tpu.core_type<tc>, window_params = [{transform_indices = @transform_0, window_bounds = array<i64: 16, 1>}, {pipeline_mode = #tpu.pipeline_mode<synchronous>, transform_indices = @transform_1, window_bounds = array<i64: 1, 128>}, {pipeline_mode = #tpu.pipeline_mode<synchronous>, transform_indices = @transform_2, window_bounds = array<i64: 256, 128>}, {pipeline_mode = #tpu.pipeline_mode<synchronous>, transform_indices = @transform_3, window_bounds = array<i64: 1, 128>}, {pipeline_mode = #tpu.pipeline_mode<synchronous>, transform_indices = @transform_4, window_bounds = array<i64: 128, 128>}, {pipeline_mode = #tpu.pipeline_mode<synchronous>, transform_indices = @transform_5, window_bounds = array<i64: 1, 128>}, {transform_indices = @transform_6, window_bounds = array<i64: 16, 128>}]} {
    %c0 = arith.constant 0 : index
    %c0_0 = arith.constant 0 : index
    %0 = vector.load %arg1[%c0, %c0_0] : memref<16x1xf32, #tpu.memory_space<vmem>>, vector<16x1xf32>
    %c0_1 = arith.constant 0 : index
    %c0_2 = arith.constant 0 : index
    %1 = vector.load %arg2[%c0_1, %c0_2] : memref<1x128xf32, #tpu.memory_space<vmem>>, vector<1x128xf32>
    %2 = vector.broadcast %0 : vector<16x1xf32> to vector<16x128xf32>
    %3 = vector.broadcast %1 : vector<1x128xf32> to vector<16x128xf32>
    %4 = arith.mulf %2, %3 : vector<16x128xf32>
    %5 = math.cos %4 : vector<16x128xf32>
    %c0_3 = arith.constant 0 : index
    %c0_4 = arith.constant 0 : index
    %6 = vector.load %arg8[%c0_3, %c0_4] : memref<16x256xf32, #tpu.memory_space<vmem>>, vector<16x128xf32>
    tpu.vector_store %arg8[%c0_3, %c0_4], %5 {strides = array<i32>} : memref<16x256xf32, #tpu.memory_space<vmem>>, vector<16x128xf32>,
    %7 = math.sin %4 : vector<16x128xf32>
    %c0_5 = arith.constant 0 : index
    %c128 = arith.constant 128 : index
    %8 = vector.load %arg8[%c0_5, %c128] : memref<16x256xf32, #tpu.memory_space<vmem>>, vector<16x128xf32>
    tpu.vector_store %arg8[%c0_5, %c128], %7 {strides = array<i32>} : memref<16x256xf32, #tpu.memory_space<vmem>>, vector<16x128xf32>,
    %c0_6 = arith.constant 0 : index
    %c0_7 = arith.constant 0 : index
    %9 = vector.load %arg8[%c0_6, %c0_7] : memref<16x256xf32, #tpu.memory_space<vmem>>, vector<16x256xf32>
    %c0_8 = arith.constant 0 : index
    %c0_9 = arith.constant 0 : index
    %10 = vector.load %arg3[%c0_8, %c0_9] : memref<256x128xf32, #tpu.memory_space<vmem>>, vector<256x128xf32>
    %cst = arith.constant dense<0.000000e+00> : vector<16x128xf32>
    %11 = tpu.matmul %9, %10, %cst {dimension_numbers = #tpu.dot_dimension_numbers<[1], [0], [0], [1], [0, 0, 1, 1], [], []>} : vector<16x256xf32>, vector<256x128xf32>, vector<16x128xf32> -> vector<16x128xf32>
    %c0_10 = arith.constant 0 : index
    %c0_11 = arith.constant 0 : index
    %12 = vector.load %arg4[%c0_10, %c0_11] : memref<1x128xf32, #tpu.memory_space<vmem>>, vector<1x128xf32>
    %13 = vector.broadcast %12 : vector<1x128xf32> to vector<16x128xf32>
    %14 = arith.addf %11, %13 : vector<16x128xf32>
    %15 = arith.negf %14 : vector<16x128xf32>
    %16 = math.exp %15 : vector<16x128xf32>
    %cst_12 = arith.constant 1.000000e+00 : f32
    %17 = vector.broadcast %cst_12 : f32 to vector<16x128xf32>
    %18 = arith.addf %17, %16 : vector<16x128xf32>
    %19 = arith.divf %17, %18 : vector<16x128xf32>
    %20 = arith.mulf %14, %19 : vector<16x128xf32>
    %c0_13 = arith.constant 0 : index
    %c0_14 = arith.constant 0 : index
    %21 = vector.load %arg5[%c0_13, %c0_14] : memref<128x128xf32, #tpu.memory_space<vmem>>, vector<128x128xf32>
    %cst_15 = arith.constant dense<0.000000e+00> : vector<16x128xf32>
    %22 = tpu.matmul %20, %21, %cst_15 {dimension_numbers = #tpu.dot_dimension_numbers<[1], [0], [0], [1], [0, 0, 1, 1], [], []>} : vector<16x128xf32>, vector<128x128xf32>, vector<16x128xf32> -> vector<16x128xf32>
    %c0_16 = arith.constant 0 : index
    %c0_17 = arith.constant 0 : index
    %23 = vector.load %arg6[%c0_16, %c0_17] : memref<1x128xf32, #tpu.memory_space<vmem>>, vector<1x128xf32>
    %24 = vector.broadcast %23 : vector<1x128xf32> to vector<16x128xf32>
    %25 = arith.addf %22, %24 : vector<16x128xf32>
    %c0_18 = arith.constant 0 : index
    %c0_19 = arith.constant 0 : index
    %26 = vector.load %arg7[%c0_18, %c0_19] : memref<16x128xf32, #tpu.memory_space<vmem>>, vector<16x128xf32>
    tpu.vector_store %arg7[%c0_18, %c0_19], %25 {strides = array<i32>} : memref<16x128xf32, #tpu.memory_space<vmem>>, vector<16x128xf32>,
    return
  }
  func.func @transform_0(%arg0: i32) -> (i32, i32) {
    %c0_i32 = arith.constant 0 : i32
    %c0_i32_0 = arith.constant 0 : i32
    return %arg0, %c0_i32 : i32, i32
  }
  func.func @transform_1(%arg0: i32) -> (i32, i32) {
    %c0_i32 = arith.constant 0 : i32
    %c0_i32_0 = arith.constant 0 : i32
    %c0_i32_1 = arith.constant 0 : i32
    return %c0_i32, %c0_i32_0 : i32, i32
  }
  func.func @transform_2(%arg0: i32) -> (i32, i32) {
    %c0_i32 = arith.constant 0 : i32
    %c0_i32_0 = arith.constant 0 : i32
    %c0_i32_1 = arith.constant 0 : i32
    return %c0_i32, %c0_i32_0 : i32, i32
  }
  func.func @transform_3(%arg0: i32) -> (i32, i32) {
    %c0_i32 = arith.constant 0 : i32
    %c0_i32_0 = arith.constant 0 : i32
    %c0_i32_1 = arith.constant 0 : i32
    return %c0_i32, %c0_i32_0 : i32, i32
  }
  func.func @transform_4(%arg0: i32) -> (i32, i32) {
    %c0_i32 = arith.constant 0 : i32
    %c0_i32_0 = arith.constant 0 : i32
    %c0_i32_1 = arith.constant 0 : i32
    return %c0_i32, %c0_i32_0 : i32, i32
  }
  func.func @transform_5(%arg0: i32) -> (i32, i32) {
    %c0_i32 = arith.constant 0 : i32
    %c0_i32_0 = arith.constant 0 : i32
    %c0_i32_1 = arith.constant 0 : i32
    return %c0_i32, %c0_i32_0 : i32, i32
  }
  func.func @transform_6(%arg0: i32) -> (i32, i32) {
    %c0_i32 = arith.constant 0 : i32
    %c0_i32_0 = arith.constant 0 : i32
    return %arg0, %c0_i32 : i32, i32
  }
}

</mosaic_0001>

<bundles_post_ra>
// kernel: tpu_custom_call.1
= control target key start
LH: loop header
LB: loop body
LE: loop exit
PB: predicated region body
PF: predicated region fallthrough
CT: control target
= control target key end

     0   :  { %11 = vsyncpa [#allocation4], 0  ;;  %s1279_s0 = inlined_call_operand.vmem [shape: f32[16,1], index: 0, kind: input, shape index: {}]   ;;  %s1280_s1 = inlined_call_operand.vmem [shape: f32[1,128], index: 1, kind: input, shape index: {}]   ;;  %s1281_s2 = inlined_call_operand.hbm [shape: f32[256,128], index: 2, kind: input, shape index: {}]   ;;  %s1282_s3 = inlined_call_operand.vmem [shape: f32[1,128], index: 3, kind: input, shape index: {}]   ;;  %s1283_s4 = inlined_call_operand.hbm [shape: f32[128,128], index: 4, kind: input, shape index: {}]   ;;  %s1284_s5 = inlined_call_operand.vmem [shape: f32[1,128], index: 5, kind: input, shape index: {}]   ;;  %s1285_s6 = inlined_call_operand.hbm [shape: f32[16,128], index: 6, kind: output, shape index: {}]  }
   0x1   :  { %12 = vsyncpa [#allocation7], 0 }
   0x2   :  { %13 = vsyncpa [#allocation5], 0  ;;  %s22_s23 = sshll.u32 %s1281_s2, 4  ;;  %s1019_s24 = smov [#allocation3]   ;;  %s23_s23 = int_to_ptr.hbm [resolvable:$true] %s22_s23 }
   0x3   :  { %s24_s25 = sshll.u32 %s1019_s24, 4  ;;  %s37_s28 = sshll.u32 %s1283_s4, 4  ;;  %s25_s25 = int_to_ptr.vmem [resolvable:$true] %s24_s25  ;;  %s38_s28 = int_to_ptr.hbm [resolvable:$true] %s37_s28 }
   0x4   :  { %s1020_s29 = smov 128   ;;  %s1021_s30 = smov 8  }
   0x5   :  { %30 = dma.hbm_to_vmem [thread:$0]  %s23_s23, 4096, %s25_s25, [#allocation4], %s1020_s29, %s1020_s29, %s1021_s30  }
   0x6   :  { %s1022_s7 = smov [#allocation6]  }
   0x7   :  { %s39_s8 = sshll.u32 %s1022_s7, 4  ;;  %s40_s8 = int_to_ptr.vmem [resolvable:$true] %s39_s8 }
   0x8   :  { %45 = dma.hbm_to_vmem [thread:$0]  %s38_s28, 2048, %s40_s8, [#allocation7], %s1020_s29, %s1020_s29, %s1021_s30  }
   0x9   :  { %1013 = dma.done.wait [#allocation4], 4096  }
   0xa   :  { %1014 = vsyncadd [#allocation4], 4294963200 }
   0xb   :  { %1015 = dma.done.wait [#allocation7], 2048  }
   0xc   :  { %1016 = vsyncadd [#allocation7], 4294965248  ;;  %v1023_v0 = vmov 0   ;;  %v56_v1 = vld [vmem:[%s1279_s0] sm:$0xff]  ;;  %v57_v2 = vld [vmem:[%s1279_s0 + $0x8] sm:$0xff]  ;;  %s1030_s14 = smov [#allocation8]  }
   0xd   :  { %929 = vset.pattern.permute.xlu0 %v1023_v0  ;;  %v930_v3 = vld [vmem:[%s1280_s1] ss:$0 sm:$0xff]  ;;  %v715_v4 = vld [vmem:[#allocation3 + $0x78] sm:$0xff]  ;;  %v714_v6 = vld [vmem:[#allocation3 + $0x70] sm:$0xff]  ;;  %v1024_v41 = vmov 2102212464  }
   0xe   :  { %61 = vperm.xlu0 %929, %v56_v1   ;;  %v731_v5 = vld [vmem:[#allocation3 + $0xf8] sm:$0xff]  ;;  %736 = vmatpush.msra.mxu0 %v715_v4  ;;  %v730_v7 = vld [vmem:[#allocation3 + $0xf0] sm:$0xff]  ;;  %v713_v9 = vld [vmem:[#allocation3 + $0x68] sm:$0xff]  ;;  %v1025_v44 = vmov 920167782   ;;  %s871_s15 = sshll.u32 %s1030_s14, 4  ;;  %s872_s15 = int_to_ptr.vmem [resolvable:$true] %s871_s15 }
   0xf   :  { %759 = vmatpush.msra.mxu1 %v731_v5  ;;  %v729_v10 = vld [vmem:[#allocation3 + $0xe8] sm:$0xff]  ;;  %901 = vmatpush.msra.mxu3 %v715_v4  ;;  %v712_v12 = vld [vmem:[#allocation3 + $0x60] sm:$0xff]  ;;  %v711_v15 = vld [vmem:[#allocation3 + $0x58] sm:$0xff]  ;;  %v1026_v49 = vmov 683565275   ;;  %s873_s18 = sshll.u32 %s1285_s6, 4  ;;  %s874_s18 = int_to_ptr.hbm [resolvable:$true] %s873_s18 }
  0x10   :  { %737 = vmatpush.msra.mxu0 %v714_v6  ;;  %v728_v13 = vld [vmem:[#allocation3 + $0xe0] sm:$0xff]  ;;  %v727_v16 = vld [vmem:[#allocation3 + $0xd8] sm:$0xff]  ;;  %v710_v19 = vld [vmem:[#allocation3 + $0x50] sm:$0xff]  ;;  %v1027_v51 = vmov 2475754826  }
  0x11   :  { %760 = vmatpush.msra.mxu1 %v730_v7  ;;  %902 = vmatpush.msra.mxu3 %v714_v6  ;;  %v726_v20 = vld [vmem:[#allocation3 + $0xd0] sm:$0xff]  ;;  %v709_v23 = vld [vmem:[#allocation3 + $0x48] sm:$0xff]  ;;  %v708_v28 = vld [vmem:[#allocation3 + $0x40] sm:$0xff]  ;;  %v1028_v54 = vmov 1326507024  }
  0x12   :  { %738 = vmatpush.msra.mxu0 %v713_v9  ;;  %v725_v24 = vld [vmem:[#allocation3 + $0xc8] sm:$0xff]  ;;  %v724_v29 = vld [vmem:[#allocation3 + $0xc0] sm:$0xff]  ;;  %v707_v32 = vld [vmem:[#allocation3 + $0x38] sm:$0xff]  ;;  %v1029_v56 = vmov 2131351028  }
  0x13   :  { %761 = vmatpush.msra.mxu1 %v729_v10  ;;  %903 = vmatpush.msra.mxu3 %v713_v9  ;;  %v723_v33 = vld [vmem:[#allocation3 + $0xb8] sm:$0xff]  ;;  %v706_v37 = vld [vmem:[#allocation3 + $0x30] sm:$0xff]  ;;  %v705_v47 = vld [vmem:[#allocation3 + $0x28] sm:$0xff] }
  0x14   :  { %739 = vmatpush.msra.mxu0 %v712_v12  ;;  %v722_v38 = vld [vmem:[#allocation3 + $0xb0] sm:$0xff]  ;;  %v721_v48 = vld [vmem:[#allocation3 + $0xa8] sm:$0xff]  ;;  %v704_v60 = vld [vmem:[#allocation3 + $0x20] sm:$0xff] }
  0x15   :  { %762 = vmatpush.msra.mxu1 %v728_v13  ;;  %904 = vmatpush.msra.mxu3 %v712_v12  ;;  %v720_v61 = vld [vmem:[#allocation3 + $0xa0] sm:$0xff]  ;;  %v703_v5 = vld [vmem:[#allocation3 + $0x18] sm:$0xff] }
  0x16   :  { %66 = vperm.xlu0 %929, %v57_v2   ;;  %740 = vmatpush.msra.mxu0 %v711_v15  ;;  %v719_v6 = vld [vmem:[#allocation3 + $0x98] sm:$0xff] }
  0x17   :  { %763 = vmatpush.msra.mxu1 %v727_v16  ;;  %905 = vmatpush.msra.mxu3 %v711_v15  ;;  %v702_v15 = vld [vmem:[#allocation3 + $0x10] sm:$0xff] }
  0x18   :  { %741 = vmatpush.msra.mxu0 %v710_v19  ;;  %v718_v16 = vld [vmem:[#allocation3 + $0x90] sm:$0xff] }
  0x19   :  { %764 = vmatpush.msra.mxu1 %v726_v20  ;;  %906 = vmatpush.msra.mxu3 %v710_v19  ;;  %v701_v20 = vld [vmem:[#allocation3 + $0x8] sm:$0xff] }
  0x1a   :  { %742 = vmatpush.msra.mxu0 %v709_v23 }
  0x1b   :  { %765 = vmatpush.msra.mxu1 %v725_v24  ;;  %907 = vmatpush.msra.mxu3 %v709_v23 }
  0x1c   :  { %743 = vmatpush.msra.mxu0 %v708_v28 }
  0x1d   :  { %766 = vmatpush.msra.mxu1 %v724_v29  ;;  %908 = vmatpush.msra.mxu3 %v708_v28 }
  0x1e   :  { %744 = vmatpush.msra.mxu0 %v707_v32 }
  0x1f   :  { %767 = vmatpush.msra.mxu1 %v723_v33  ;;  %909 = vmatpush.msra.mxu3 %v707_v32 }
  0x20   :  { %745 = vmatpush.msra.mxu0 %v706_v37 }
  0x21   :  { %768 = vmatpush.msra.mxu1 %v722_v38  ;;  %910 = vmatpush.msra.mxu3 %v706_v37 }
  0x22   :  { %746 = vmatpush.msra.mxu0 %v705_v47 }
  0x23   :  { %769 = vmatpush.msra.mxu1 %v721_v48  ;;  %911 = vmatpush.msra.mxu3 %v705_v47 }
  0x24   :  { %747 = vmatpush.msra.mxu0 %v704_v60 }
  0x25   :  { %770 = vmatpush.msra.mxu1 %v720_v61  ;;  %912 = vmatpush.msra.mxu3 %v704_v60 }
  0x26   :  { %748 = vmatpush.msra.mxu0 %v703_v5 }
  0x27   :  { %771 = vmatpush.msra.mxu1 %v719_v6  ;;  %913 = vmatpush.msra.mxu3 %v703_v5 }
  0x28   :  { %749 = vmatpush.msra.mxu0 %v702_v15 }
  0x29   :  { %772 = vmatpush.msra.mxu1 %v718_v16  ;;  %914 = vmatpush.msra.mxu3 %v702_v15 }
  0x2a   :  { %750 = vmatpush.msra.mxu0 %v701_v20 }
  0x2b   :  { %915 = vmatpush.msra.mxu3 %v701_v20 }
  0x80   :  { %v62_v8 = vpop.permute.xlu0 %61 }
  0x81   :  { %v1088_v11 = vmul.f32 %v930_v3, %v62_v8 }
  0x83   :  { %v77_v14 = vand.u32 2139095040, %v1088_v11  ;;  %v74_v18 = vand.u32 2147483647, %v1088_v11 }
  0x85   :  { %v78_v17 = vshrl.u32 %v77_v14, 23  ;;  %v81_v27 = vand.u32 8388607, %v74_v18 }
  0x87   :  { %v887_v21 = vadd.s32 4294967169, %v78_v17  ;;  %v82_v36 = vor.u32 8388608, %v81_v27 }
  0x88   :  { %v67_v22 = vpop.permute.xlu0 %66 }
  0x89   :  { %v84_v25 = vadd.s32 1, %v887_v21  ;;  %v1092_v26 = vmul.f32 %v930_v3, %v67_v22  ;;  %v1107_v58 = vshll.u32 %v82_v36, 8  ;;  %v716_v36 = vld [vmem:[#allocation3 + $0x80] sm:$0xff] }
  0x8b   :  { %vm85_vm0 = vcmp.gt.s32.totalorder %v84_v25, 0  ;;  %v231_v30 = vand.u32 2139095040, %v1092_v26  ;;  %v228_v43 = vand.u32 2147483647, %v1092_v26  ;;  %v123_v13 = vand.u32 65535, %v1107_v58 }
  0x8c   :  { %v86_v31 = vsel %vm85_vm0, %v84_v25, 0  ;;  %v124_v17 = vshrl.u32 %v1107_v58, 16  ;;  %v717_v25 = vld [vmem:[#allocation3 + $0x88] sm:$0xff] }
  0x8d   :  { %v88_v34 = vand.u32 31, %v86_v31  ;;  %v232_v35 = vshrl.u32 %v231_v30, 23  ;;  %v1097_v39 = vshrl.u32 %v86_v31, 5  ;;  %v1115_v4 = vand.u32 8388607, %v228_v43  ;;  %773 = vmatpush.msra.mxu1 %v717_v25 }
  0x8f   :  { %v89_v40 = vsub.s32 32, %v88_v34  ;;  %v100_v42 = vshll.u32 %v1024_v41, %v88_v34  ;;  %v103_v45 = vshll.u32 %v1025_v44, %v88_v34  ;;  %v890_v46 = vadd.s32 4294967169, %v232_v35  ;;  %v700_v35 = vld [vmem:[#allocation3] sm:$0xff]  ;;  %774 = vmatpush.msra.mxu1 %v716_v36 }
  0x90   :  { %v91_v50 = vshll.u32 %v1026_v49, %v88_v34  ;;  %v94_v52 = vshll.u32 %v1027_v51, %v88_v34  ;;  %v97_v57 = vshll.u32 %v1029_v56, %v88_v34  ;;  %vm109_vm1 = vcmp.lt.s32.totalorder %v1097_v39, 4  ;;  %751 = vmatpush.msra.mxu0 %v700_v35  ;;  %916 = vmatpush.msra.mxu3 %v700_v35 }
  0x91   :  { %v101_v53 = vshrl.u32 %v1025_v44, %v89_v40  ;;  %v104_v55 = vshrl.u32 %v1028_v54, %v89_v40  ;;  %v238_v59 = vadd.s32 1, %v890_v46  ;;  %v92_v62 = vshrl.u32 %v1027_v51, %v89_v40 }
  0x92   :  { %v95_v63 = vshrl.u32 %v1029_v56, %v89_v40  ;;  %v98_v1 = vshrl.u32 %v1024_v41, %v89_v40  ;;  %vm106_vm3 = vcmp.lt.s32.totalorder %v1097_v39, 1  ;;  %vm108_vm4 = vcmp.lt.s32.totalorder %v1097_v39, 3 }
  0x93   :  { %v102_v2 = vor.u32 %v101_v53, %v100_v42  ;;  %v105_v3 = vor.u32 %v104_v55, %v103_v45  ;;  %vm239_vm2 = vcmp.gt.s32.totalorder %v238_v59, 0  ;;  %v93_v7 = vor.u32 %v92_v62, %v91_v50 }
  0x94   :  { %v96_v8 = vor.u32 %v95_v63, %v94_v52  ;;  %v99_v9 = vor.u32 %v98_v1, %v97_v57  ;;  %v240_v12 = vsel %vm239_vm2, %v238_v59, 0  ;;  %v90_v21 = vshrl.u32 %v1026_v49, %v89_v40 }
  0x95   :  { %v115_v10 = vsel %vm109_vm1, %v102_v2, 920167782  ;;  %v1120_v14 = vand.u32 31, %v240_v12  ;;  %v119_v19 = vsel %vm109_vm1, %v105_v3, 1326507024  ;;  %vm107_vm5 = vcmp.lt.s32.totalorder %v1097_v39, 2 }
  0x96   :  { %v114_v22 = vsel %vm106_vm3, %v93_v7, %v96_v8  ;;  %v116_v23 = vsel %vm108_vm4, %v99_v9, %v115_v10  ;;  %v111_v27 = vsel %vm109_vm1, %v99_v9, 2102212464  ;;  %v236_v28 = vor.u32 8388608, %v1115_v4 }
  0x97   :  { %v1133_v24 = vsub.s32 32, %v1120_v14  ;;  %v1139_v29 = vshrl.u32 %v240_v12, 5  ;;  %v110_v30 = vsel %vm106_vm3, %v90_v21, %v93_v7  ;;  %v117_v31 = vsel %vm107_vm5, %v114_v22, %v116_v23 }
  0x98   :  { %v118_v32 = vsel %vm106_vm3, %v96_v8, %v99_v9  ;;  %v254_v33 = vshll.u32 %v1024_v41, %v1120_v14  ;;  %v120_v37 = vsel %vm108_vm4, %v102_v2, %v119_v19  ;;  %v147_v38 = vand.u32 65535, %v117_v31 }
  0x99   :  { %v255_v34 = vshrl.u32 %v1025_v44, %v1133_v24  ;;  %v258_v40 = vshrl.u32 %v1028_v54, %v1133_v24  ;;  %v112_v42 = vsel %vm108_vm4, %v96_v8, %v111_v27  ;;  %v121_v45 = vsel %vm107_vm5, %v118_v32, %v120_v37 }
  0x9a   :  { %v148_v46 = vshrl.u32 %v117_v31, 16  ;;  %v125_v48 = vand.u32 65535, %v121_v45  ;;  %v126_v50 = vshrl.u32 %v121_v45, 16  ;;  %v257_v52 = vshll.u32 %v1025_v44, %v1120_v14 }
  0x9b   :  { %v256_v47 = vor.u32 %v255_v34, %v254_v33  ;;  %v151_v54 = vmul.u32 %v147_v38, %v124_v17  ;;  %vm263_vm6 = vcmp.lt.s32.totalorder %v1139_v29, 4  ;;  %v1164_v55 = vsel %vm107_vm5, %v110_v30, %v112_v42 }
  0x9c   :  { %v150_v53 = vmul.u32 %v148_v46, %v123_v13  ;;  %v128_v57 = vmul.u32 %v126_v50, %v123_v13  ;;  %v1166_v59 = vshll.u32 %v236_v28, 8  ;;  %v259_v60 = vor.u32 %v258_v40, %v257_v52 }
  0x9d   :  { %v129_v61 = vmul.u32 %v125_v48, %v124_v17  ;;  %v149_v62 = vmul.u32 %v147_v38, %v123_v13  ;;  %v269_v44 = vsel %vm263_vm6, %v256_v47, 920167782  ;;  %v127_v1 = vmul.u32 %v125_v48, %v123_v13 }
  0x9e   :  { %v153_v63 = vshll.u32 %v150_v53, 16  ;;  %v130_v2 = vmul.u32 %v126_v50, %v124_v17  ;;  %v131_v3 = vshll.u32 %v128_v57, 16  ;;  %v152_v5 = vmul.u32 %v148_v46, %v124_v17 }
  0x9f   :  { %v133_v4 = vshll.u32 %v129_v61, 16  ;;  %v155_v6 = vshll.u32 %v151_v54, 16  ;;  %v245_v12 = vshll.u32 %v1026_v49, %v1120_v14  ;;  %v246_v13 = vshrl.u32 %v1027_v51, %v1133_v24 }
  0xa0   :  { %vm157_vm7 = vc.u32 %v149_v62, %v153_v63  ;;  %vm135_vm8 = vc.u32 %v127_v1, %v131_v3  ;;  %v137_v39 = vadd.s32 %v131_v3, %v127_v1  ;;  %v159_v8 = vadd.s32 %v153_v63, %v149_v62 }
  0xa1   :  { %v158_v7 = vsel %vm157_vm7, 1, %v1023_v0  ;;  %v136_v9 = vsel %vm135_vm8, 1, %v1023_v0  ;;  %v132_v15 = vshrl.u32 %v128_v57, 16  ;;  %v154_v19 = vshrl.u32 %v150_v53, 16 }
  0xa2   :  { %v160_v10 = vadd.s32 %v158_v7, %v152_v5  ;;  %v138_v16 = vadd.s32 %v136_v9, %v130_v2  ;;  %vm139_vm9 = vc.u32 %v137_v39, %v133_v4  ;;  %vm161_vm10 = vc.u32 %v159_v8, %v155_v6 }
  0xa3   :  { %v140_v17 = vsel %vm139_vm9, 1, %v1023_v0  ;;  %v162_v20 = vsel %vm161_vm10, 1, %v1023_v0  ;;  %v1178_v21 = vor.u32 %v246_v13, %v245_v12  ;;  %v248_v25 = vshll.u32 %v1027_v51, %v1120_v14 }
  0xa4   :  { %v142_v22 = vadd.s32 %v140_v17, %v138_v16  ;;  %v164_v23 = vadd.s32 %v162_v20, %v160_v10  ;;  %v249_v27 = vshrl.u32 %v1029_v56, %v1133_v24  ;;  %v273_v28 = vsel %vm263_vm6, %v259_v60, 1326507024 }
  0xa5   :  { %v134_v30 = vshrl.u32 %v129_v61, 16  ;;  %v251_v31 = vshll.u32 %v1029_v56, %v1120_v14  ;;  %v252_v32 = vshrl.u32 %v1024_v41, %v1133_v24  ;;  %v156_v34 = vshrl.u32 %v151_v54, 16 }
  0xa6   :  { %v143_v33 = vadd.s32 %v142_v22, %v132_v15  ;;  %v165_v35 = vadd.s32 %v164_v23, %v154_v19  ;;  %v1190_v36 = vor.u32 %v249_v27, %v248_v25  ;;  %v1192_v37 = vadd.s32 %v159_v8, %v155_v6 }
  0xa7   :  { %v253_v51 = vor.u32 %v252_v32, %v251_v31  ;;  %vm260_vm11 = vcmp.lt.s32.totalorder %v1139_v29, 1  ;;  %vm262_vm12 = vcmp.lt.s32.totalorder %v1139_v29, 3  ;;  %v167_v45 = vmul.u32 %v1107_v58, %v1164_v55 }
  0xa8   :  { %v1196_v38 = vadd.s32 %v143_v33, %v134_v30  ;;  %v166_v40 = vadd.s32 %v165_v35, %v156_v34  ;;  %v268_v41 = vsel %vm260_vm11, %v1178_v21, %v1190_v36  ;;  %v274_v56 = vsel %vm262_vm12, %v256_v47, %v273_v28 }
  0xa9   :  { %v270_v14 = vsel %vm262_vm12, %v253_v51, %v269_v44  ;;  %v272_v42 = vsel %vm260_vm11, %v1190_v36, %v253_v51  ;;  %vm261_vm14 = vcmp.lt.s32.totalorder %v1139_v29, 2  ;;  %v277_v50 = vand.u32 65535, %v1166_v59 }
  0xaa   :  { %vm169_vm13 = vc.u32 %v1196_v38, %v1192_v37  ;;  %v170_v46 = vadd.s32 1, %v166_v40  ;;  %v271_v48 = vsel %vm261_vm14, %v268_v41, %v270_v14  ;;  %v275_v47 = vsel %vm261_vm14, %v272_v42, %v274_v56 }
  0xab   :  { %v278_v52 = vshrl.u32 %v1166_v59, 16  ;;  %v279_v54 = vand.u32 65535, %v275_v47  ;;  %v280_v57 = vshrl.u32 %v275_v47, 16  ;;  %v301_v58 = vand.u32 65535, %v271_v48 }
  0xac   :  { %v171_v53 = vsel %vm169_vm13, %v170_v46, %v166_v40  ;;  %v302_v60 = vshrl.u32 %v271_v48, 16  ;;  %v265_v32 = vsel %vm263_vm6, %v253_v51, 2102212464  ;;  %v244_v34 = vshrl.u32 %v1026_v49, %v1133_v24 }
  0xad   :  { %v172_v55 = vadd.s32 %v171_v53, %v167_v45  ;;  %v282_v61 = vmul.u32 %v280_v57, %v277_v50  ;;  %v283_v62 = vmul.u32 %v279_v54, %v278_v52  ;;  %v305_v1 = vmul.u32 %v301_v58, %v278_v52 }
  0xae   :  { %v304_v44 = vmul.u32 %v302_v60, %v277_v50  ;;  %v281_v2 = vmul.u32 %v279_v54, %v277_v50  ;;  %v284_v5 = vmul.u32 %v280_v57, %v278_v52  ;;  %v303_v6 = vmul.u32 %v301_v58, %v277_v50 }
  0xaf   :  { %v173_v63 = vadd.s32 536870912, %v172_v55  ;;  %v285_v3 = vshll.u32 %v282_v61, 16  ;;  %v287_v7 = vshll.u32 %v283_v62, 16  ;;  %v306_v9 = vmul.u32 %v302_v60, %v278_v52 }
  0xb0   :  { %v307_v39 = vshll.u32 %v304_v44, 16  ;;  %v309_v13 = vshll.u32 %v305_v1, 16  ;;  %v286_v22 = vshrl.u32 %v282_v61, 16  ;;  %v288_v35 = vshrl.u32 %v283_v62, 16 }
  0xb1   :  { %v1220_v4 = vshrl.u32 %v173_v63, 30  ;;  %vm289_vm15 = vc.u32 %v281_v2, %v285_v3  ;;  %v291_v8 = vadd.s32 %v285_v3, %v281_v2  ;;  %v308_v41 = vshrl.u32 %v304_v44, 16 }
  0xb2   :  { %v290_v12 = vsel %vm289_vm15, 1, %v1023_v0  ;;  %vm311_vm0 = vc.u32 %v303_v6, %v307_v39  ;;  %v313_v17 = vadd.s32 %v307_v39, %v303_v6  ;;  %v264_v14 = vsel %vm260_vm11, %v244_v34, %v1178_v21 }
  0xb3   :  { %v175_v10 = vshll.u32 %v1220_v4, 30  ;;  %v292_v15 = vadd.s32 %v290_v12, %v284_v5  ;;  %vm293_vm1 = vc.u32 %v291_v8, %v287_v7  ;;  %v312_v16 = vsel %vm311_vm0, 1, %v1023_v0 }
  0xb4   :  { %v294_v20 = vsel %vm293_vm1, 1, %v1023_v0  ;;  %v314_v25 = vadd.s32 %v312_v16, %v306_v9  ;;  %vm315_vm2 = vc.u32 %v313_v17, %v309_v13  ;;  %v310_v45 = vshrl.u32 %v305_v1, 16 }
  0xb5   :  { %v176_v19 = vsub.s32 %v172_v55, %v175_v10  ;;  %v296_v23 = vadd.s32 %v294_v20, %v292_v15  ;;  %v316_v30 = vsel %vm315_vm2, 1, %v1023_v0  ;;  %v266_v0 = vsel %vm262_vm12, %v1190_v36, %v265_v32 }
  0xb6   :  { %v318_v40 = vadd.s32 %v316_v30, %v314_v25  ;;  %v317_v51 = vadd.s32 %v313_v17, %v309_v13  ;;  %v267_v49 = vsel %vm261_vm14, %v264_v14, %v266_v0  ;;  %v168_v47 = vadd.s32 %v1192_v37, %v1196_v38 }
  0xb7   :  { %vm177_vm3 = vcmp.lt.s32.totalorder %v176_v19, 0  ;;  %v178_v27 = vsub.s32 0, %v176_v19  ;;  %v297_v28 = vadd.s32 %v296_v23, %v286_v22  ;;  %v321_v57 = vmul.u32 %v1166_v59, %v267_v49 }
  0xb8   :  { %v319_v46 = vadd.s32 %v318_v40, %v308_v41  ;;  %vm76_vm6 = vcmp.lt.s32.totalorder %v1088_v11, 0  ;;  %vm1248_vm7 = vcmp.le.f32.partialorder %v74_v18, 0.7853982  ;;  %v198_v39 = vsub.s32 4, %v1220_v4 }
  0xb9   :  { %v179_v31 = vsel %vm177_vm3, %v178_v27, %v176_v19  ;;  %v298_v42 = vadd.s32 %v297_v28, %v288_v35  ;;  %vm217_vm0 = vweird.f32 %v1088_v11  ;;  %vm230_vm1 = vcmp.lt.s32.totalorder %v1092_v26, 0 }
  0xba   :  { %v180_v33 = vclz %v179_v31  ;;  %v320_v24 = vadd.s32 %v319_v46, %v310_v45  ;;  %v199_v15 = vsel %vm76_vm6, %v198_v39, %v1220_v4  ;;  %vm229_vm2 = vcmp.le.f32.partialorder %v228_v43, 0.7853982 }
  0xbb   :  { %vm323_vm5 = vc.u32 %v298_v42, %v317_v51  ;;  %v322_v25 = vadd.s32 %v317_v51, %v298_v42 }
  0xbc   :  { %v888_v56 = vadd.s32 4294967294, %v180_v33  ;;  %v324_v21 = vadd.s32 1, %v320_v24 }
  0xbe   :  { %vm889_vm4 = vcmp.lt.s32.totalorder %v888_v56, 0  ;;  %v325_v58 = vsel %vm323_vm5, %v324_v21, %v320_v24 }
  0xbf   :  { %v183_v48 = vsel %vm889_vm4, 0, %v888_v56  ;;  %v326_v61 = vadd.s32 %v325_v58, %v321_v57 }
  0xc0   :  { %v184_v50 = vsub.s32 32, %v183_v48  ;;  %v188_v52 = vsub.s32 4294967266, %v183_v48  ;;  %v185_v53 = vshll.u32 %v176_v19, %v183_v48  ;;  %v201_v19 = vsel %vm1248_vm7, 0, %v199_v15 }
  0xc1   :  { %v327_v29 = vadd.s32 536870912, %v326_v61  ;;  %v528_v32 = vadd.s32 3, %v201_v19  ;;  %v218_v45 = vand.u32 3, %v201_v19 }
  0xc2   :  { %v186_v54 = vshrl.u32 %v168_v47, %v184_v50  ;;  %v189_v36 = vadd.s32 127, %v188_v52 }
  0xc3   :  { %v1242_v1 = vshrl.u32 %v327_v29, 30  ;;  %v529_v46 = vand.u32 3, %v528_v32  ;;  %vm219_vm10 = vcmp.lt.s32.totalorder %v218_v45, 2  ;;  %vm220_vm11 = vcmp.eq.s32.totalorder %v218_v45, 0  ;;  %v834_v32 = vld [vmem:[#allocation6 + $0x60] sm:$0xff] }
  0xc4   :  { %v187_v55 = vor.u32 %v186_v54, %v185_v53  ;;  %v190_v60 = vshll.u32 %v189_v36, 23  ;;  %vm223_vm12 = vcmp.eq.s32.totalorder %v218_v45, 2  ;;  %v829_v45 = vld [vmem:[#allocation6 + $0x38] sm:$0xff] }
  0xc5   :  { %v329_v38 = vshll.u32 %v1242_v1, 30  ;;  %vm530_vm13 = vcmp.lt.s32.totalorder %v529_v46, 2  ;;  %vm531_vm14 = vcmp.eq.s32.totalorder %v529_v46, 0  ;;  %vm534_vm15 = vcmp.eq.s32.totalorder %v529_v46, 2  ;;  %v828_v46 = vld [vmem:[#allocation6 + $0x30] sm:$0xff] }
  0xc6   :  { %v191_v62 = vor.u32 4788187, %v190_v60  ;;  %v194_v44 = vcvt.s32.f32 %v187_v55 }
  0xc7   :  { %v330_v3 = vsub.s32 %v326_v61, %v329_v38 }
  0xc8   :  { %v192_v63 = vand.u32 2147483647, %v191_v62  ;;  %v352_v62 = vsub.s32 4, %v1242_v1 }
  0xc9   :  { %vm331_vm8 = vcmp.lt.s32.totalorder %v330_v3, 0  ;;  %v332_v6 = vsub.s32 0, %v330_v3 }
  0xca   :  { %v195_v37 = vmul.f32 %v194_v44, %v192_v63 }
  0xcb   :  { %v333_v9 = vsel %vm331_vm8, %v332_v6, %v330_v3 }
  0xcc   :  { %v196_v2 = vxor.u32 2147483648, %v195_v37  ;;  %v334_v10 = vclz %v333_v9 }
  0xce   :  { %v197_v5 = vsel %vm76_vm6, %v196_v2, %v195_v37  ;;  %v891_v18 = vadd.s32 4294967294, %v334_v10  ;;  %v353_v37 = vsel %vm230_vm1, %v352_v62, %v1242_v1 }
  0xcf   :  { %v200_v7 = vsel %vm1248_vm7, %v1088_v11, %v197_v5 }
  0xd0   :  { %v202_v8 = vmul.f32 %v200_v7, %v200_v7  ;;  %vm892_vm9 = vcmp.lt.s32.totalorder %v891_v18, 0 }
  0xd1   :  { %v337_v23 = vsel %vm892_vm9, 0, %v891_v18  ;;  %vm371_vm9 = vweird.f32 %v1092_v26 }
  0xd2   :  { %v203_v12 = vmul.f32 -0.001358992, %v202_v8  ;;  %v210_v13 = vmul.f32 -0.00019511016, %v202_v8  ;;  %v338_v27 = vsub.s32 32, %v337_v23  ;;  %v342_v28 = vsub.s32 4294967266, %v337_v23 }
  0xd3   :  { %v339_v33 = vshll.u32 %v330_v3, %v337_v23  ;;  %v355_v3 = vsel %vm229_vm2, 0, %v353_v37 }
  0xd4   :  { %v204_v16 = vadd.f32 0.041655596, %v203_v12  ;;  %v211_v17 = vadd.f32 0.008332121, %v210_v13  ;;  %v340_v34 = vshrl.u32 %v322_v25, %v338_v27  ;;  %v343_v35 = vadd.s32 127, %v342_v28  ;;  %v837_v28 = vld [vmem:[#allocation6 + $0x78] sm:$0xff] }
  0xd5   :  { %v372_v12 = vand.u32 3, %v355_v3  ;;  %842 = vmatpush.msra.mxu2 %v837_v28 }
  0xd6   :  { %v205_v20 = vmul.f32 %v204_v16, %v202_v8  ;;  %v212_v22 = vmul.f32 %v211_v17, %v202_v8  ;;  %v341_v41 = vor.u32 %v340_v34, %v339_v33  ;;  %v344_v56 = vshll.u32 %v343_v35, 23  ;;  %v833_v33 = vld [vmem:[#allocation6 + $0x58] sm:$0xff]  ;;  %v832_v34 = vld [vmem:[#allocation6 + $0x50] sm:$0xff] }
  0xd7   :  { %vm373_vm3 = vcmp.lt.s32.totalorder %v372_v12, 2  ;;  %vm374_vm4 = vcmp.eq.s32.totalorder %v372_v12, 0  ;;  %vm377_vm5 = vcmp.eq.s32.totalorder %v372_v12, 2 }
  0xd8   :  { %v206_v30 = vadd.f32 -0.4999988, %v205_v20  ;;  %v213_v31 = vadd.f32 -0.16666654, %v212_v22  ;;  %v345_v48 = vor.u32 4788187, %v344_v56  ;;  %v348_v51 = vcvt.s32.f32 %v341_v41 }
  0xda   :  { %v207_v4 = vmul.f32 %v206_v30, %v202_v8  ;;  %v214_v40 = vmul.f32 %v213_v31, %v202_v8  ;;  %v346_v42 = vand.u32 2147483647, %v345_v48  ;;  %v836_v30 = vld [vmem:[#allocation6 + $0x70] sm:$0xff]  ;;  %v835_v31 = vld [vmem:[#allocation6 + $0x68] sm:$0xff] }
  0xdb   :  { %843 = vmatpush.msra.mxu2 %v836_v30  ;;  %v827_v48 = vld [vmem:[#allocation6 + $0x28] sm:$0xff] }
  0xdc   :  { %v208_v14 = vadd.f32 1.0, %v207_v4  ;;  %v215_v0 = vadd.f32 1.0, %v214_v40  ;;  %v349_v50 = vmul.f32 %v348_v51, %v346_v42  ;;  %v831_v40 = vld [vmem:[#allocation6 + $0x48] sm:$0xff]  ;;  %v825_v42 = vld [vmem:[#allocation6 + $0x18] sm:$0xff]  ;;  %v824_v51 = vld [vmem:[#allocation6 + $0x10] sm:$0xff] }
  0xdd   :  { %844 = vmatpush.msra.mxu2 %v835_v31 }
  0xde   :  { %v216_v49 = vmul.f32 %v215_v0, %v200_v7  ;;  %v224_v24 = vxor.u32 2147483648, %v208_v14  ;;  %v350_v58 = vxor.u32 2147483648, %v349_v50  ;;  %v683_v7 = vadd.s32 3, %v355_v3 }
  0xdf   :  { %845 = vmatpush.msra.mxu2 %v834_v32 }
  0xe0   :  { %v221_v47 = vxor.u32 2147483648, %v216_v49  ;;  %v225_v21 = vsel %vm223_vm12, %v224_v24, %v216_v49  ;;  %v536_v54 = vsel %vm534_vm15, %v224_v24, %v216_v49  ;;  %v351_v61 = vsel %vm230_vm1, %v350_v58, %v349_v50  ;;  %v826_v49 = vld [vmem:[#allocation6 + $0x20] sm:$0xff]  ;;  %v823_v50 = vld [vmem:[#allocation6 + $0x8] sm:$0xff] }
  0xe1   :  { %v354_v29 = vsel %vm229_vm2, %v1092_v26, %v351_v61  ;;  %v684_v13 = vand.u32 3, %v683_v7  ;;  %846 = vmatpush.msra.mxu2 %v833_v33  ;;  %v931_v26 = vld [vmem:[%s1282_s3] ss:$0 sm:$0xff] }
  0xe2   :  { %v222_v52 = vsel %vm220_vm11, %v208_v14, %v221_v47  ;;  %v533_v53 = vsel %vm531_vm14, %v208_v14, %v221_v47  ;;  %v356_v63 = vmul.f32 %v354_v29, %v354_v29  ;;  %v830_v14 = vld [vmem:[#allocation6 + $0x40] sm:$0xff] }
  0xe3   :  { %v226_v36 = vsel %vm219_vm10, %v222_v52, %v225_v21  ;;  %v537_v57 = vsel %vm530_vm13, %v533_v53, %v536_v54  ;;  %vm685_vm6 = vcmp.lt.s32.totalorder %v684_v13, 2  ;;  %vm686_vm7 = vcmp.eq.s32.totalorder %v684_v13, 0  ;;  %847 = vmatpush.msra.mxu2 %v832_v34  ;;  %v822_v52 = vld [vmem:[#allocation6] sm:$0xff] }
  0xe4   :  { %v227_v55 = vsel %vm217_vm0, nan, %v226_v36  ;;  %v538_v60 = vsel %vm217_vm0, nan, %v537_v57  ;;  %v357_v44 = vmul.f32 -0.001358992, %v356_v63  ;;  %v364_v11 = vmul.f32 -0.00019511016, %v356_v63 }
  0xe5   :  { %752 = vmatmul.f32.vlgmr.msra.gmra.mxu0 %v227_v55  ;;  %775 = vmatmul.f32.vlgmr.msra.gmra.mxu1 %v538_v60  ;;  %vm689_vm8 = vcmp.eq.s32.totalorder %v684_v13, 2 }
  0xe6   :  { %v358_v38 = vadd.f32 0.041655596, %v357_v44  ;;  %v365_v2 = vadd.f32 0.008332121, %v364_v11  ;;  %848 = vmatpush.msra.mxu2 %v831_v40 }
  0xe8   :  { %v359_v59 = vmul.f32 %v358_v38, %v356_v63  ;;  %v366_v5 = vmul.f32 %v365_v2, %v356_v63  ;;  %849 = vmatpush.msra.mxu2 %v830_v14 }
  0xea   :  { %v360_v6 = vadd.f32 -0.4999988, %v359_v59  ;;  %v367_v39 = vadd.f32 -0.16666654, %v366_v5  ;;  %850 = vmatpush.msra.mxu2 %v829_v45 }
  0xec   :  { %v361_v8 = vmul.f32 %v360_v6, %v356_v63  ;;  %v368_v43 = vmul.f32 %v367_v39, %v356_v63  ;;  %851 = vmatpush.msra.mxu2 %v828_v46 }
  0xee   :  { %v362_v9 = vadd.f32 1.0, %v361_v8  ;;  %v369_v10 = vadd.f32 1.0, %v368_v43  ;;  %852 = vmatpush.msra.mxu2 %v827_v48 }
  0xf0   :  { %v370_v15 = vmul.f32 %v369_v10, %v354_v29  ;;  %v378_v18 = vxor.u32 2147483648, %v362_v9  ;;  %853 = vmatpush.msra.mxu2 %v826_v49 }
  0xf2   :  { %v375_v16 = vxor.u32 2147483648, %v370_v15  ;;  %v379_v17 = vsel %vm377_vm5, %v378_v18, %v370_v15  ;;  %v691_v20 = vsel %vm689_vm8, %v378_v18, %v370_v15  ;;  %854 = vmatpush.msra.mxu2 %v825_v42  ;;  %v932_v15 = vld [vmem:[%s1284_s5] ss:$0 sm:$0xff] }
  0xf4   :  { %v376_v1 = vsel %vm374_vm4, %v362_v9, %v375_v16  ;;  %v688_v19 = vsel %vm686_vm7, %v362_v9, %v375_v16  ;;  %855 = vmatpush.msra.mxu2 %v824_v51 }
  0xf5   :  { %v380_v22 = vsel %vm373_vm3, %v376_v1, %v379_v17  ;;  %v692_v23 = vsel %vm685_vm6, %v688_v19, %v691_v20 }
  0xf6   :  { %v381_v25 = vsel %vm371_vm9, nan, %v380_v22  ;;  %v693_v27 = vsel %vm371_vm9, nan, %v692_v23  ;;  %856 = vmatpush.msra.mxu2 %v823_v50 }
  0xf7   :  { %755 = vmatmul.f32.vlgmr.msra.gmra.mxu3 %v381_v25  ;;  %778 = vmatmul.f32.gmra.mxu1 %v693_v27 }
  0xf8   :  { %857 = vmatpush.msra.mxu2 %v822_v52 }
 0x162   :  { %v753_v35 = vpop.f32.mrf.mxu0  ;;  %v776_v41 = vpop.f32.mrf.mxu1 }
 0x163   :  { %v754_v4 = vadd.f32 %v931_v26, %v753_v35 }
 0x165   :  { %v777_v56 = vadd.f32 %v776_v41, %v754_v4 }
 0x167   :  { %v899_v0 = vmul.f32 -1.442695, %v777_v56 }
 0x169   :  { %933 = vpow2.f32 %v899_v0 }
 0x16f   :  { %v934_v24 = vpop.eup %933 }
 0x170   :  { %v788_v47 = vadd.f32 1.0, %v934_v24 }
 0x172   :  { %935 = vrcp.f32 %v788_v47  ;;  %v801_v36 = vand.u32 2147483648, %v788_v47  ;;  %v799_v58 = vand.u32 2147483647, %v788_v47  ;;  %vm795_vm11 = vweird.f32 %v788_v47 }
 0x174   :  { %v802_v62 = vor.u32 1.1754944e-38, %v801_v36  ;;  %v779_v29 = vpop.f32.mrf.mxu1  ;;  %vm800_vm13 = vcmp.eq.f32.partialorder %v799_v58, 8.507059e+37 }
 0x178   :  { %v936_v21 = vpop.eup %935 }
 0x179   :  { %v791_v53 = vmul.f32 %v936_v21, %v788_v47  ;;  %vm796_vm10 = vweird.f32 %v936_v21 }
 0x17a   :  { %v756_v55 = vpop.f32.mrf.mxu3  ;;  %vm797_vm12 = vmor %vm795_vm11, %vm796_vm10 }
 0x17b   :  { %v792_v54 = vsub.f32 1.0, %v791_v53  ;;  %v757_v61 = vadd.f32 %v931_v26, %v756_v55 }
 0x17d   :  { %v793_v57 = vmul.f32 %v936_v21, %v792_v54  ;;  %v780_v44 = vadd.f32 %v779_v29, %v757_v61 }
 0x17f   :  { %v794_v60 = vadd.f32 %v936_v21, %v793_v57  ;;  %v900_v38 = vmul.f32 -1.442695, %v780_v44 }
 0x181   :  { %v798_v63 = vsel %vm797_vm12, %v936_v21, %v794_v60  ;;  %937 = vpow2.f32 %v900_v38 }
 0x182   :  { %v803_v11 = vsel %vm800_vm13, %v802_v62, %v798_v63 }
 0x183   :  { %v820_v37 = vmul.f32 %v803_v11, %v777_v56 }
 0x185   :  { %858 = vmatmul.f32.vlgmr.msra.gmra.mxu2 %v820_v37 }
 0x187   :  { %v938_v2 = vpop.eup %937 }
 0x188   :  { %v789_v3 = vadd.f32 1.0, %v938_v2 }
 0x18a   :  { %939 = vrcp.f32 %v789_v3  ;;  %v816_v39 = vand.u32 2147483648, %v789_v3  ;;  %v814_v8 = vand.u32 2147483647, %v789_v3  ;;  %vm810_vm15 = vweird.f32 %v789_v3 }
 0x18c   :  { %v817_v9 = vor.u32 1.1754944e-38, %v816_v39  ;;  %vm815_vm1 = vcmp.eq.f32.partialorder %v814_v8, 8.507059e+37 }
 0x190   :  { %v940_v59 = vpop.eup %939 }
 0x191   :  { %v806_v5 = vmul.f32 %v940_v59, %v789_v3  ;;  %vm811_vm14 = vweird.f32 %v940_v59 }
 0x192   :  { %vm812_vm0 = vmor %vm810_vm15, %vm811_vm14 }
 0x193   :  { %v807_v6 = vsub.f32 1.0, %v806_v5 }
 0x195   :  { %v808_v7 = vmul.f32 %v940_v59, %v807_v6 }
 0x197   :  { %v809_v43 = vadd.f32 %v940_v59, %v808_v7 }
 0x199   :  { %v813_v10 = vsel %vm812_vm0, %v940_v59, %v809_v43 }
 0x19a   :  { %v818_v12 = vsel %vm815_vm1, %v817_v9, %v813_v10 }
 0x19b   :  { %v821_v13 = vmul.f32 %v818_v12, %v780_v44 }
 0x19d   :  { %861 = vmatmul.f32.gmra.mxu2 %v821_v13 }
 0x208   :  { %v859_v18 = vpop.f32.mrf.mxu2 }
 0x209   :  { %v860_v16 = vadd.f32 %v932_v15, %v859_v18 }
 0x20b   :  { %865 = vst [vmem:[#allocation8] sm:$0xff] %v860_v16 }
 0x220   :  { %v862_v1 = vpop.f32.mrf.mxu2 }
 0x221   :  { %v863_v17 = vadd.f32 %v932_v15, %v862_v1 }
 0x223   :  { %866 = vst [vmem:[#allocation8 + $0x8] sm:$0xff] %v863_v17 }
 0x224   :  { %879 = dma.vmem_to_hbm [thread:$0]  %s872_s15, 256, %s874_s18, [#allocation5], %s1020_s29, %s1020_s29, %s1021_s30  }
 0x225   :  { %1017 = dma.done.wait [#allocation5], 256  }
 0x226   :  { %1018 = vsyncadd [#allocation5], 4294967040 }
 0x227   :  { %884 = vsyncpa [#allocation4], 1 }
 0x228   :  { %885 = vsyncpa [#allocation7], 1 }
 0x229   :  { %886 = vsyncpa [#allocation5], 1 }

</bundles_post_ra>
